<compile_context>
chip_gen: v5e
topology: v5e:2x2
jax: 0.10.0
libtpu: 0.0.40
codegen_flags: <defaults>
</compile_context>

<pallas_src>
import jax
import jax.numpy as jnp
from jax.experimental import pallas as pl
from jax.experimental.pallas import tpu as pltpu


def _round_up(x, m):
    return (x + m - 1) // m * m


# --------------------------------------------------------------------------
# Kernel: ReLU (f32) -> bf16 cast -> MXU matmul (f32 accumulate) -> + bias.
# Grid is (outer0, outer1, k) with k the (possibly trivial) latent_dim
# reduction axis; acc_ref persists across k (output block index is k-invariant).
# --------------------------------------------------------------------------
def _classifier_kernel(x_ref, w_ref, b_ref, o_ref, acc_ref):
    k = pl.program_id(2)

    @pl.when(k == 0)
    def _():
        acc_ref[...] = jnp.zeros_like(acc_ref)

    # ReLU on the f32 source (eval-mode dropout == identity), then cast to
    # bf16 for the MXU; accumulate in f32.
    x = jnp.maximum(x_ref[...], 0.0).astype(jnp.bfloat16)
    acc_ref[...] += jnp.dot(x, w_ref[...], preferred_element_type=jnp.float32)

    @pl.when(k == pl.num_programs(2) - 1)
    def _():
        o_ref[...] = (acc_ref[...] + b_ref[...]).astype(o_ref.dtype)


# --------------------------------------------------------------------------
# Host-side planning helpers.
# --------------------------------------------------------------------------
def _k_plan(D):
    """K-tiling plan: tk == D (no tiling) unless latent_dim is very large."""
    MAX_K_BLOCK = 4096
    if D <= MAX_K_BLOCK:
        return D, D, 1                      # tk, Dp, nk
    nk = -(-D // 2048)
    tk = _round_up(-(-D // nk), 128)
    return tk, tk * nk, nk


def _vmem_plan():
    """Generation-aware (budget, scoped-limit) in bytes."""
    try:
        cap = int(pltpu.get_tpu_info().vmem_capacity_bytes)
    except Exception:
        cap = 64 * 1024 * 1024              # conservative (v7x-sized) fallback
    budget = (cap * 3) // 8                 # ~48 MiB v5e/v6e, ~24 MiB v7x
    limit = cap // 2                        # explicit scoped-VMEM cap
    return budget, limit


def _select_mn_tiles(B, tk, Cp, budget, out_bytes):
    """Pick (tm, tn, Bp) that fit the VMEM budget."""
    base_tm = min(512, _round_up(B, 8))
    tm_cands = [base_tm] + [t for t in (512, 256, 128, 64, 32, 16, 8)
                            if t < base_tm]
    tn_cands = sorted({t for t in (Cp, 2048, 1024, 512, 256, 128)
                       if t <= min(Cp, 2048) and Cp % t == 0}, reverse=True)

    def ws(tm, tn):
        # double-buffered x(f32) / w(bf16) / bias / out blocks + f32 acc scratch
        return (2 * (tm * tk * 4 + tk * tn * 2 + tn * 4 + tm * tn * out_bytes)
                + tm * tn * 4)

    # Prefer wide class tiles (>=256 fills the 256-wide v6e/v7x MXU), but do
    # not shrink the batch tile below 128 rows to get them.
    for tm_floor in (128, 8):
        for tn in tn_cands:
            for tm in tm_cands:
                if tm < min(tm_floor, base_tm):
                    continue
                if ws(tm, tn) > budget:
                    continue
                Bp = _round_up(B, tm)
                # Reduce batch-padding waste: take a smaller (still fitting)
                # batch tile if it removes >=12.5% of the padded rows.
                for smaller in tm_cands:
                    if smaller >= tm:
                        continue
                    Bp_s = _round_up(B, smaller)
                    if 8 * (Bp - Bp_s) >= Bp and ws(smaller, tn) <= budget:
                        tm, Bp = smaller, Bp_s
                        break
                return tm, tn, Bp
    tm = 8
    return tm, 128, _round_up(B, tm)        # pathological fallback


# --------------------------------------------------------------------------
# One-time parameter repack (cache the result across calls).
# --------------------------------------------------------------------------
def prepare_classifier_params(weight_t, bias):
    """Repack nn.Linear params once: bf16 weight, lane-dense class padding.

    weight_t: [latent_dim, num_classes]  (transpose of the PyTorch weight)
    bias    : [num_classes]
    """
    D, C = weight_t.shape
    assert bias.shape == (C,)
    tk, Dp, _ = _k_plan(D)
    del tk
    Cp = _round_up(max(C, 128), 128)        # lane-dense output columns
    w = weight_t.astype(jnp.bfloat16)
    if (Dp, Cp) != (D, C):
        w = jnp.pad(w, ((0, Dp - D), (0, Cp - C)))
    b = bias.astype(jnp.float32)
    if Cp != C:
        b = jnp.pad(b, (0, Cp - C))
    return w, b.reshape(1, Cp), (D, C)


# --------------------------------------------------------------------------
# Forward pass: relu(latents) @ W^T + b    (eval-mode dropout == identity).
# --------------------------------------------------------------------------
def image_latents_classifier(latents, prepared, *, out_dtype=jnp.float32):
    """latents: [B, latent_dim] (any float dtype; cast/ReLU happen in-kernel).

    `prepared` comes from prepare_classifier_params (cache it across calls).
    Set out_dtype=jnp.bfloat16 to halve output writeback if acceptable.
    """
    w, b2, (D, C) = prepared
    assert latents.ndim == 2 and latents.shape[1] == D
    B = latents.shape[0]
    Dp, Cp = w.shape
    tk, _, nk = _k_plan(D)

    budget, vmem_limit = _vmem_plan()
    out_bytes = jnp.dtype(out_dtype).itemsize
    tm, tn, Bp = _select_mn_tiles(B, tk, Cp, budget, out_bytes)

    # Pad latents only when required (tiny for batch; D-padding only when
    # K-tiled, i.e. latent_dim > 4096).
    x = latents
    if Bp != B or Dp != D:
        x = jnp.pad(x, ((0, Bp - B), (0, Dp - D)))

    ni, nj = Bp // tm, Cp // tn

    # Grid order by estimated HBM traffic: the operand tied to the OUTER axis
    # stays resident; the other is re-streamed once per outer step.
    x_bytes = Bp * Dp * x.dtype.itemsize
    w_bytes = Dp * Cp * 2
    bytes_batch_outer = x_bytes * (1 if nk == 1 else nj) + w_bytes * ni
    bytes_class_outer = w_bytes * (1 if nk == 1 else ni) + x_bytes * nj
    batch_outer = bytes_batch_outer <= bytes_class_outer

    if batch_outer:
        grid = (ni, nj, nk)
        x_map = lambda i, j, k: (i, k)
        w_map = lambda i, j, k: (k, j)
        b_map = lambda i, j, k: (0, j)
        o_map = lambda i, j, k: (i, j)
    else:
        grid = (nj, ni, nk)
        x_map = lambda j, i, k: (i, k)
        w_map = lambda j, i, k: (k, j)
        b_map = lambda j, i, k: (0, j)
        o_map = lambda j, i, k: (i, j)

    out = pl.pallas_call(
        _classifier_kernel,
        out_shape=jax.ShapeDtypeStruct((Bp, Cp), out_dtype),
        grid_spec=pltpu.PrefetchScalarGridSpec(
            num_scalar_prefetch=0,
            grid=grid,
            in_specs=[
                pl.BlockSpec((tm, tk), x_map),   # latents tile (f32)
                pl.BlockSpec((tk, tn), w_map),   # weight tile (bf16, prepacked)
                pl.BlockSpec((1, tn), b_map),    # bias tile (f32)
            ],
            out_specs=pl.BlockSpec((tm, tn), o_map),
            scratch_shapes=[pltpu.VMEM((tm, tn), jnp.float32)],
        ),
        compiler_params=pltpu.CompilerParams(
            dimension_semantics=("parallel", "parallel", "arbitrary"),
            vmem_limit_bytes=int(vmem_limit)),
        cost_estimate=pl.CostEstimate(
            flops=2 * Bp * Dp * Cp,
            transcendentals=0,
            bytes_accessed=min(bytes_batch_outer, bytes_class_outer)
            + Cp * 4 + Bp * Cp * out_bytes),
    )(x, w, b2)

    if Bp != B or Cp != C:
        # TODO(synk): consumers that can fuse this slice should take the
        # padded slab directly to skip one extra output pass.
        out = out[:B, :C]
    return out


if __name__ == "__main__":
    # Small shapes implied by the module (a classifier head on image latents).
    # Deliberately awkward sizes (B not a multiple of 8, C not a multiple of
    # 128) to exercise the padding / lane-dense-output path.
    B, latent_dim, num_classes = 6, 128, 10

    key = jax.random.PRNGKey(0)
    k_lat, k_w, k_b = jax.random.split(key, 3)

    # Synthetic "image latents".
    # TODO(synk): `trained_model` is an external black-box backbone with no
    # defined architecture here, so the kernel consumes its latents directly.
    latents = jax.random.normal(k_lat, (B, latent_dim), dtype=jnp.float32)

    # nn.Linear(latent_dim, num_classes): PyTorch weight is [C, D]; store W^T.
    bound = 1.0 / jnp.sqrt(jnp.float32(latent_dim))
    w_pt = jax.random.uniform(k_w, (num_classes, latent_dim),
                              minval=-bound, maxval=bound, dtype=jnp.float32)
    b_pt = jax.random.uniform(k_b, (num_classes,),
                              minval=-bound, maxval=bound, dtype=jnp.float32)
    weight_t = w_pt.T

    # TODO(synk): only eval-mode dropout (identity) is implemented; a
    # training-mode kernel would need pltpu.prng_seed/prng_random_bits masking.

    prepared = prepare_classifier_params(weight_t, b_pt)   # one-time repack
    out = image_latents_classifier(latents, prepared)
    out = jax.block_until_ready(out)

    # Reference with the same bf16 operand quantization + f32 accumulate.
    x_ref = jnp.maximum(latents, 0).astype(jnp.bfloat16).astype(jnp.float32)
    w_ref = weight_t.astype(jnp.bfloat16).astype(jnp.float32)
    ref = x_ref @ w_ref + b_pt

    assert out.shape == (B, num_classes)
    assert jnp.allclose(out, ref, atol=1e-3, rtol=1e-3), \
        float(jnp.max(jnp.abs(out - ref)))

    print("KERNEL_OK")
</pallas_src>

<mosaic_0001>
module attributes {stable_mosaic.version = 11 : i64} {
  func.func @_classifier_kernel(%arg0: i32, %arg1: i32, %arg2: i32, %arg3: memref<8x128xf32, #tpu.memory_space<vmem>>, %arg4: memref<128x128xbf16, #tpu.memory_space<vmem>>, %arg5: memref<1x128xf32, #tpu.memory_space<vmem>>, %arg6: memref<8x128xf32, #tpu.memory_space<vmem>>, %arg7: memref<8x128xf32, #tpu.memory_space<vmem>>) attributes {dimension_semantics = [#tpu.dimension_semantics<parallel>, #tpu.dimension_semantics<parallel>, #tpu.dimension_semantics<arbitrary>], iteration_bounds = array<i64: 1, 1, 1>, scalar_prefetch = 0 : i64, scratch_operands = 1 : i64, tpu.core_type = #tpu.core_type<tc>, window_params = [{transform_indices = @transform_0, window_bounds = array<i64: 8, 128>}, {transform_indices = @transform_1, window_bounds = array<i64: 128, 128>}, {transform_indices = @transform_2, window_bounds = array<i64: 1, 128>}, {transform_indices = @transform_3, window_bounds = array<i64: 8, 128>}]} {
    %c0_i32 = arith.constant 0 : i32
    %0 = arith.cmpi eq, %arg2, %c0_i32 : i32
    %1 = arith.extui %0 : i1 to i32
    %c0_i32_0 = arith.constant 0 : i32
    %2 = arith.cmpi ne, %1, %c0_i32_0 : i32
    scf.if %2 {
      %cst_11 = arith.constant 0.000000e+00 : f32
      %15 = vector.broadcast %cst_11 : f32 to vector<8x128xf32>
      %c0_12 = arith.constant 0 : index
      %c0_13 = arith.constant 0 : index
      %16 = vector.load %arg7[%c0_12, %c0_13] : memref<8x128xf32, #tpu.memory_space<vmem>>, vector<8x128xf32>
      tpu.vector_store %arg7[%c0_12, %c0_13], %15 {strides = array<i32>} : memref<8x128xf32, #tpu.memory_space<vmem>>, vector<8x128xf32>,
    } else {
    }
    %c0 = arith.constant 0 : index
    %c0_1 = arith.constant 0 : index
    %3 = vector.load %arg3[%c0, %c0_1] : memref<8x128xf32, #tpu.memory_space<vmem>>, vector<8x128xf32>
    %cst = arith.constant 0.000000e+00 : f32
    %4 = vector.broadcast %cst : f32 to vector<8x128xf32>
    %5 = arith.maximumf %3, %4 : vector<8x128xf32>
    %6 = arith.truncf %5 : vector<8x128xf32> to vector<8x128xbf16>
    %c0_2 = arith.constant 0 : index
    %c0_3 = arith.constant 0 : index
    %7 = vector.load %arg7[%c0_2, %c0_3] : memref<8x128xf32, #tpu.memory_space<vmem>>, vector<8x128xf32>
    %c0_4 = arith.constant 0 : index
    %c0_5 = arith.constant 0 : index
    %8 = vector.load %arg4[%c0_4, %c0_5] : memref<128x128xbf16, #tpu.memory_space<vmem>>, vector<128x128xbf16>
    %cst_6 = arith.constant dense<0.000000e+00> : vector<8x128xf32>
    %9 = tpu.matmul %6, %8, %cst_6 {dimension_numbers = #tpu.dot_dimension_numbers<[1], [0], [0], [1], [0, 0, 1, 1], [], []>} : vector<8x128xbf16>, vector<128x128xbf16>, vector<8x128xf32> -> vector<8x128xf32>
    %10 = arith.addf %7, %9 : vector<8x128xf32>
    %c0_7 = arith.constant 0 : index
    %c0_8 = arith.constant 0 : index
    %11 = vector.load %arg7[%c0_7, %c0_8] : memref<8x128xf32, #tpu.memory_space<vmem>>, vector<8x128xf32>
    tpu.vector_store %arg7[%c0_7, %c0_8], %10 {strides = array<i32>} : memref<8x128xf32, #tpu.memory_space<vmem>>, vector<8x128xf32>,
    %c0_i32_9 = arith.constant 0 : i32
    %12 = arith.cmpi eq, %arg2, %c0_i32_9 : i32
    %13 = arith.extui %12 : i1 to i32
    %c0_i32_10 = arith.constant 0 : i32
    %14 = arith.cmpi ne, %13, %c0_i32_10 : i32
    scf.if %14 {
      %c0_11 = arith.constant 0 : index
      %c0_12 = arith.constant 0 : index
      %15 = vector.load %arg7[%c0_11, %c0_12] : memref<8x128xf32, #tpu.memory_space<vmem>>, vector<8x128xf32>
      %c0_13 = arith.constant 0 : index
      %c0_14 = arith.constant 0 : index
      %16 = vector.load %arg5[%c0_13, %c0_14] : memref<1x128xf32, #tpu.memory_space<vmem>>, vector<1x128xf32>
      %17 = vector.broadcast %16 : vector<1x128xf32> to vector<8x128xf32>
      %18 = arith.addf %15, %17 : vector<8x128xf32>
      %c0_15 = arith.constant 0 : index
      %c0_16 = arith.constant 0 : index
      %19 = vector.load %arg6[%c0_15, %c0_16] : memref<8x128xf32, #tpu.memory_space<vmem>>, vector<8x128xf32>
      tpu.vector_store %arg6[%c0_15, %c0_16], %18 {strides = array<i32>} : memref<8x128xf32, #tpu.memory_space<vmem>>, vector<8x128xf32>,
    } else {
    }
    return
  }
  func.func @transform_0(%arg0: i32, %arg1: i32, %arg2: i32) -> (i32, i32) {
    %c0_i32 = arith.constant 0 : i32
    return %arg0, %arg2 : i32, i32
  }
  func.func @transform_1(%arg0: i32, %arg1: i32, %arg2: i32) -> (i32, i32) {
    %c0_i32 = arith.constant 0 : i32
    return %arg2, %arg1 : i32, i32
  }
  func.func @transform_2(%arg0: i32, %arg1: i32, %arg2: i32) -> (i32, i32) {
    %c0_i32 = arith.constant 0 : i32
    %c0_i32_0 = arith.constant 0 : i32
    return %c0_i32, %arg1 : i32, i32
  }
  func.func @transform_3(%arg0: i32, %arg1: i32, %arg2: i32) -> (i32, i32) {
    %c0_i32 = arith.constant 0 : i32
    return %arg0, %arg1 : i32, i32
  }
}

</mosaic_0001>

<bundles_post_ra>
// kernel: tpu_custom_call.1
= control target key start
LH: loop header
LB: loop body
LE: loop exit
PB: predicated region body
PF: predicated region fallthrough
CT: control target
= control target key end

     0   :  { %8 = vsyncpa [#allocation4], 0  ;;  %s322_s0 = inlined_call_operand.hbm [shape: f32[8,128], index: 0, kind: input, shape index: {}]   ;;  %s323_s1 = inlined_call_operand.hbm [shape: bf16[128,128], index: 1, kind: input, shape index: {}]   ;;  %s324_s2 = inlined_call_operand.vmem [shape: f32[1,128], index: 2, kind: input, shape index: {}]   ;;  %s325_s3 = inlined_call_operand.hbm [shape: f32[8,128], index: 3, kind: output, shape index: {}]  }
   0x1   :  { %9 = vsyncpa [#allocation7], 0 }
   0x2   :  { %10 = vsyncpa [#allocation5], 0  ;;  %s16_s14 = sshll.u32 %s322_s0, 4  ;;  %s285_s15 = smov [#allocation3]   ;;  %s17_s14 = int_to_ptr.hbm [resolvable:$true] %s16_s14 }
   0x3   :  { %s18_s16 = sshll.u32 %s285_s15, 4  ;;  %s26_s19 = sshll.u32 %s323_s1, 4  ;;  %s19_s16 = int_to_ptr.vmem [resolvable:$true] %s18_s16  ;;  %s27_s19 = int_to_ptr.hbm [resolvable:$true] %s26_s19 }
   0x4   :  { %21 = dma.hbm_to_vmem [thread:$0]  %s17_s14, 128, %s19_s16, [#allocation4]  }
   0x5   :  { %s286_s20 = smov [#allocation6]   ;;  %s287_s22 = smov 64  }
   0x6   :  { %s28_s21 = sshll.u32 %s286_s20, 4  ;;  %s288_s23 = smov 4   ;;  %s29_s21 = int_to_ptr.vmem [resolvable:$true] %s28_s21 }
   0x7   :  { %34 = dma.hbm_to_vmem [thread:$0]  %s27_s19, 1024, %s29_s21, [#allocation7], %s287_s22, %s287_s22, %s288_s23  }
   0x8   :  { %279 = dma.done.wait [#allocation4], 128  }
   0x9   :  { %280 = vsyncadd [#allocation4], 4294967168 }
   0xa   :  { %281 = dma.done.wait [#allocation7], 1024  }
   0xb   :  { %282 = vsyncadd [#allocation7], 4294966272  ;;  %v200_v0 = vld [vmem:[#allocation6 + $0x38] sm:$0xff]  ;;  %v199_v1 = vld [vmem:[#allocation6 + $0x30] sm:$0xff]  ;;  %s289_s24 = smov [#allocation8]   ;;  %s150_s28 = sshll.u32 %s325_s3, 4  ;;  %s151_s28 = int_to_ptr.hbm [resolvable:$true] %s150_s28 }
   0xc   :  { %118 = vmatpush.bf16.msra.mxu0 %v200_v0  ;;  %v198_v2 = vld [vmem:[#allocation6 + $0x28] sm:$0xff]  ;;  %v197_v3 = vld [vmem:[#allocation6 + $0x20] sm:$0xff]  ;;  %v196_v4 = vld [vmem:[#allocation6 + $0x18] sm:$0xff]  ;;  %s148_s25 = sshll.u32 %s289_s24, 4  ;;  %s149_s25 = int_to_ptr.vmem [resolvable:$true] %s148_s25 }
   0xd   :  { %v195_v5 = vld [vmem:[#allocation6 + $0x10] sm:$0xff]  ;;  %v194_v6 = vld [vmem:[#allocation6 + $0x8] sm:$0xff]  ;;  %v50_v7 = vld [vmem:[#allocation3] sm:$0xff] }
   0xe   :  { %v51_v8 = vmax.f32 %v50_v7, 0.0  ;;  %v193_v9 = vld [vmem:[#allocation6] sm:$0xff]  ;;  %v206_v11 = vld [vmem:[%s324_s2] ss:$0 sm:$0xff] }
  0x10   :  { %119 = vmatpush.bf16.msra.mxu0 %v199_v1  ;;  %v52_v10 = vpack.c.bf16 %v51_v8, %v51_v8 }
  0x14   :  { %120 = vmatpush.bf16.msra.mxu0 %v198_v2 }
  0x18   :  { %121 = vmatpush.bf16.msra.mxu0 %v197_v3 }
  0x1c   :  { %122 = vmatpush.bf16.msra.mxu0 %v196_v4 }
  0x20   :  { %123 = vmatpush.bf16.msra.mxu0 %v195_v5 }
  0x24   :  { %124 = vmatpush.bf16.msra.mxu0 %v194_v6 }
  0x28   :  { %125 = vmatpush.bf16.msra.mxu0 %v193_v9 }
  0x2b   :  { %126 = vmatmul.bf16.vlgmr.msra.gmra.mxu0 %v52_v10 }
  0xa8   :  { %v127_v12 = vpop.f32.mrf.mxu0 }
  0xa9   :  { %v141_v13 = vadd.f32 %v206_v11, %v127_v12 }
  0xab   :  { %142 = vst [vmem:[#allocation8] sm:$0xff] %v141_v13 }
  0xac   :  { %153 = dma.vmem_to_hbm [thread:$0]  %s149_s25, 128, %s151_s28, [#allocation5]  }
  0xb0   :  { %v129_v14 = vpop.f32.mrf.mxu0 }
  0xb1   :  { %283 = dma.done.wait [#allocation5], 128  }
  0xb2   :  { %284 = vsyncadd [#allocation5], 4294967168 }
  0xb3   :  { %158 = vsyncpa [#allocation4], 1 }
  0xb4   :  { %159 = vsyncpa [#allocation7], 1 }
  0xb5   :  { %160 = vsyncpa [#allocation5], 1 }

</bundles_post_ra>
